<compile_context>
chip_gen: v6e
topology: v6e:2x2x1
jax: 0.10.0
libtpu: 0.0.40
codegen_flags: <defaults>
</compile_context>

<pallas_src>
import functools

import jax
import jax.numpy as jnp
from jax.experimental import pallas as pl
from jax.experimental.pallas import tpu as pltpu


def _round_up(x, m):
    return (x + m - 1) // m * m


def dice_loss_kernel(logits_ref, labels_ref, out_ref, *, n_valid, tile_n):
    # logits_ref: (tile_n, C)  input dtype, natural layout (tokens on sublanes)
    # labels_ref: (1, tile_n)  int32 (tokens on lanes)
    # out_ref:    (1, 1)       float32 in SMEM (per-tile partial sum)
    x = logits_ref[...].astype(jnp.float32)                    # (tile_n, C)

    # Recover the lane-dense compute layout (tokens on lanes, classes on
    # sublanes).  This per-tile in-VMEM transpose hides under the HBM DMA of
    # the next tile; all per-token math below runs at full 128-lane width.
    xt = jnp.transpose(x, (1, 0))                               # (C, tile_n)
    labels = labels_ref[...]                                    # (1, tile_n)

    # One-hot gather of the true-class logit (torch.gather equivalent).
    class_ids = jax.lax.broadcasted_iota(jnp.int32, xt.shape, 0)
    x_true = jnp.sum(jnp.where(class_ids == labels, xt, 0.0),
                     axis=0, keepdims=True)                     # (1, tile_n)

    # p = softmax prob of the true class = 1 / sum_j exp(x_j - x_true).
    # Overflow -> denom = +inf -> p = 0 -> dsc = 1 (the correct limit), so no
    # separate max-subtraction pass is needed.
    denom = jnp.sum(jnp.exp(xt - x_true), axis=0, keepdims=True)
    p = pl.reciprocal(denom, approx=True)                       # (1, tile_n)

    # dsc = 1 - num/(num+1) == 1/(num+1)
    num = (1.0 - p) * p
    dsc = pl.reciprocal(num + 1.0, approx=True)                 # (1, tile_n)

    # Discard tokens past the end of the (unpadded) arrays: the clipped last
    # block leaves arbitrary VMEM contents (possibly NaN/Inf) in the tail.
    # jnp.where selects 0 there regardless, so nothing propagates.  Do NOT
    # replace this with arithmetic masking (0 * NaN = NaN).
    tok = (pl.program_id(0) * tile_n
           + jax.lax.broadcasted_iota(jnp.int32, (1, tile_n), 1))
    dsc = jnp.where(tok < n_valid, dsc, 0.0)

    out_ref[0, 0] = jnp.sum(dsc)


def dice_loss1(y_pred, y_true, *, tile_tokens=8192):
    """y_pred: (B, S, C) float (f32 or bf16), y_true: (B, S) int -> scalar f32."""
    B, S, C = y_pred.shape
    N = B * S

    # Token tile: multiple of 128 (it is the lane dim of the labels block and
    # the sublane dim of the logits block), capped near N/2 so the "parallel"
    # grid axis has >= 2 steps whenever there is enough work (v7x: both
    # TensorCores).  If a single tile covers everything, use the exact extent
    # N (block == full array is always layout-legal).
    tile_n = _round_up(min(tile_tokens, N), 128)
    tile_n = min(tile_n, max(128, _round_up(pl.cdiv(N, 2), 128)))
    if tile_n >= N:
        tile_n = N
    num_tiles = pl.cdiv(N, tile_n)

    # Natural layout: no transpose, no pad, dtype passed through unchanged.
    logits = y_pred.reshape(N, C)
    labels = y_true.reshape(1, N).astype(jnp.int32)   # tiny vs logits traffic

    kernel = functools.partial(dice_loss_kernel, n_valid=N, tile_n=tile_n)

    partials = pl.pallas_call(
        kernel,
        out_shape=jax.ShapeDtypeStruct((num_tiles, 1), jnp.float32),
        grid=(num_tiles,),
        in_specs=[
            pl.BlockSpec((tile_n, C), lambda i: (i, 0)),   # logits tile (VMEM)
            pl.BlockSpec((1, tile_n), lambda i: (0, i)),   # labels tile (VMEM)
        ],
        out_specs=pl.BlockSpec((1, 1), lambda i: (i, 0),
                               memory_space=pltpu.MemorySpace.SMEM),
        compiler_params=pltpu.CompilerParams(
            dimension_semantics=("parallel",),
            vmem_limit_bytes=32 * 1024 * 1024),
    )(logits, labels)

    return jnp.sum(partials)


def dice_loss1_ref(y_pred, y_true):
    """Pure-JAX reference mirroring the PyTorch module."""
    probs = jax.nn.softmax(y_pred.astype(jnp.float32), axis=-1)
    p = jnp.take_along_axis(probs, y_true[..., None].astype(jnp.int32),
                            axis=-1)[..., 0]
    num = (1.0 - p) * p
    dsc = 1.0 - num / (num + 1.0)
    return jnp.sum(dsc)


if __name__ == "__main__":
    key = jax.random.PRNGKey(0)
    k1, k2, k3, k4, k5, k6 = jax.random.split(key, 6)

    # Tolerances account for the approx (EUP) reciprocals + per-tile partial
    # sums; still far tighter than any single-token error (~1.0).
    RTOL, ATOL = 3e-3, 2e-3

    # Test 1: shapes consistent with the module (batch=2, seq=8, classes=32).
    B, S, C = 2, 8, 32
    y_pred = jax.random.normal(k1, (B, S, C), dtype=jnp.float32)
    y_true = jax.random.randint(k2, (B, S), 0, C, dtype=jnp.int32)
    loss = jax.block_until_ready(dice_loss1(y_pred, y_true))
    ref = jax.block_until_ready(dice_loss1_ref(y_pred, y_true))
    assert jnp.allclose(loss, ref, rtol=RTOL, atol=ATOL), (loss, ref)

    # Test 2: multi-tile grid over an UNPADDED ragged extent
    # (N = 300 tokens -> 3 tiles of 128; last tile has only 44 valid tokens).
    B2, S2, C2 = 4, 75, 16
    y_pred2 = jax.random.normal(k3, (B2, S2, C2), dtype=jnp.float32)
    y_true2 = jax.random.randint(k4, (B2, S2), 0, C2, dtype=jnp.int32)
    loss2 = jax.block_until_ready(dice_loss1(y_pred2, y_true2, tile_tokens=128))
    ref2 = jax.block_until_ready(dice_loss1_ref(y_pred2, y_true2))
    assert jnp.allclose(loss2, ref2, rtol=RTOL, atol=ATOL), (loss2, ref2)

    # Test 3: bf16 logits pass through unchanged (half HBM traffic); in-kernel
    # cast to f32.  N = 192 -> 2 tiles of 128, second tile clipped.
    B3, S3, C3 = 2, 96, 32
    y_pred3 = jax.random.normal(k5, (B3, S3, C3), dtype=jnp.bfloat16)
    y_true3 = jax.random.randint(k6, (B3, S3), 0, C3, dtype=jnp.int32)
    loss3 = jax.block_until_ready(dice_loss1(y_pred3, y_true3))
    ref3 = jax.block_until_ready(dice_loss1_ref(y_pred3, y_true3))
    assert jnp.allclose(loss3, ref3, rtol=RTOL, atol=ATOL), (loss3, ref3)

    print("KERNEL_OK")
</pallas_src>

<mosaic_0001>
module attributes {stable_mosaic.version = 11 : i64} {
  func.func @dice_loss_kernel(%arg0: i32, %arg1: memref<16x32xf32, #tpu.memory_space<vmem>>, %arg2: memref<1x16xi32, #tpu.memory_space<vmem>>, %arg3: memref<1x1xf32, #tpu.memory_space<smem>>) attributes {dimension_semantics = [#tpu.dimension_semantics<parallel>], iteration_bounds = array<i64: 1>, scalar_prefetch = 0 : i64, scratch_operands = 0 : i64, tpu.core_type = #tpu.core_type<tc>, window_params = [{transform_indices = @transform_0, window_bounds = array<i64: 16, 32>}, {transform_indices = @transform_1, window_bounds = array<i64: 1, 16>}, {transform_indices = @transform_2, window_bounds = array<i64: 1, 1>}]} {
    %c0 = arith.constant 0 : index
    %c0_0 = arith.constant 0 : index
    %0 = vector.load %arg1[%c0, %c0_0] : memref<16x32xf32, #tpu.memory_space<vmem>>, vector<16x32xf32>
    %1 = tpu.transpose %0, [1, 0] : vector<16x32xf32> -> vector<32x16xf32>
    %c0_1 = arith.constant 0 : index
    %c0_2 = arith.constant 0 : index
    %2 = vector.load %arg2[%c0_1, %c0_2] : memref<1x16xi32, #tpu.memory_space<vmem>>, vector<1x16xi32>
    %3 = tpu.iota {dimensions = array<i32: 0>} : vector<32x16xi32>
    %4 = vector.broadcast %2 : vector<1x16xi32> to vector<32x16xi32>
    %5 = arith.cmpi eq, %3, %4 : vector<32x16xi32>
    %cst = arith.constant 0.000000e+00 : f32
    %6 = vector.broadcast %cst : f32 to vector<32x16xf32>
    %7 = arith.select %5, %1, %6 : vector<32x16xi1>, vector<32x16xf32>
    %cst_3 = arith.constant dense<0.000000e+00> : vector<16xf32>
    %8 = vector.multi_reduction <add>, %7, %cst_3 [0] : vector<32x16xf32> to vector<16xf32>
    %9 = vector.shape_cast %8 : vector<16xf32> to vector<1x16xf32>
    %10 = vector.broadcast %9 : vector<1x16xf32> to vector<32x16xf32>
    %11 = arith.subf %1, %10 : vector<32x16xf32>
    %12 = math.exp %11 : vector<32x16xf32>
    %cst_4 = arith.constant dense<0.000000e+00> : vector<16xf32>
    %13 = vector.multi_reduction <add>, %12, %cst_4 [0] : vector<32x16xf32> to vector<16xf32>
    %14 = vector.shape_cast %13 : vector<16xf32> to vector<1x16xf32>
    %15 = tpu.reciprocal %14 {approx = true} : vector<1x16xf32> -> vector<1x16xf32>
    %cst_5 = arith.constant 1.000000e+00 : f32
    %16 = vector.broadcast %cst_5 : f32 to vector<1x16xf32>
    %17 = arith.subf %16, %15 : vector<1x16xf32>
    %18 = arith.mulf %17, %15 : vector<1x16xf32>
    %cst_6 = arith.constant 1.000000e+00 : f32
    %19 = vector.broadcast %cst_6 : f32 to vector<1x16xf32>
    %20 = arith.addf %18, %19 : vector<1x16xf32>
    %21 = tpu.reciprocal %20 {approx = true} : vector<1x16xf32> -> vector<1x16xf32>
    %c16_i32 = arith.constant 16 : i32
    %22 = arith.muli %arg0, %c16_i32 : i32
    %23 = tpu.iota {dimensions = array<i32: 1>} : vector<1x16xi32>
    %24 = vector.broadcast %22 : i32 to vector<1x16xi32>
    %25 = arith.addi %24, %23 : vector<1x16xi32>
    %c16_i32_7 = arith.constant 16 : i32
    %26 = vector.broadcast %c16_i32_7 : i32 to vector<1x16xi32>
    %27 = arith.cmpi slt, %25, %26 : vector<1x16xi32>
    %cst_8 = arith.constant 0.000000e+00 : f32
    %28 = vector.broadcast %cst_8 : f32 to vector<1x16xf32>
    %29 = arith.select %27, %21, %28 : vector<1x16xi1>, vector<1x16xf32>
    %30 = vector.shape_cast %29 : vector<1x16xf32> to vector<1x1x16xf32>
    %cst_9 = arith.constant dense<0.000000e+00> : vector<1xf32>
    %31 = vector.multi_reduction <add>, %30, %cst_9 [1, 2] : vector<1x1x16xf32> to vector<1xf32>
    %32 = vector.shape_cast %31 : vector<1xf32> to vector<1x1x1xf32>
    %33 = vector.extract %32[0, 0, 0] : f32 from vector<1x1x1xf32>
    %c0_10 = arith.constant 0 : index
    %c0_11 = arith.constant 0 : index
    %34 = memref.load %arg3[%c0_10, %c0_11] : memref<1x1xf32, #tpu.memory_space<smem>>
    memref.store %33, %arg3[%c0_10, %c0_11] : memref<1x1xf32, #tpu.memory_space<smem>>
    return
  }
  func.func @transform_0(%arg0: i32) -> (i32, i32) {
    %c0_i32 = arith.constant 0 : i32
    %c0_i32_0 = arith.constant 0 : i32
    return %arg0, %c0_i32 : i32, i32
  }
  func.func @transform_1(%arg0: i32) -> (i32, i32) {
    %c0_i32 = arith.constant 0 : i32
    %c0_i32_0 = arith.constant 0 : i32
    return %c0_i32, %arg0 : i32, i32
  }
  func.func @transform_2(%arg0: i32) -> (i32, i32) {
    %c0_i32 = arith.constant 0 : i32
    %c0_i32_0 = arith.constant 0 : i32
    return %arg0, %c0_i32 : i32, i32
  }
}

</mosaic_0001>

<bundles_post_ra>
// kernel: tpu_custom_call.1
= control target key start
LH: loop header
LB: loop body
LE: loop exit
PB: predicated region body
PF: predicated region fallthrough
CT: control target
= control target key end

     0   :  { %7 = vsyncpa [#allocation3], 0  ;;  %s246_s0 = inlined_call_operand.hbm [shape: f32[16,32], index: 0, kind: input, shape index: {}]   ;;  %s247_s1 = inlined_call_operand.vmem [shape: s32[1,16], index: 1, kind: input, shape index: {}]   ;;  %s248_s2 = inlined_call_operand.hbm [shape: f32[1,1], index: 2, kind: output, shape index: {}]  }
   0x1   :  { %8 = vsyncpa [#allocation4], 0  ;;  %s208_s9 = smov [#allocation2]  }
   0x2   :  { %s14_s10 = sshll.u32 %s208_s9, 4  ;;  %s15_s10 = int_to_ptr.vmem [resolvable:$true] %s14_s10 }
   0x3   :  { %s184_s11 = scalar_lea.vmem %s15_s10, 256  ;;  %p189_p1 = scmp.lt.s32.totalorder %s15_s10, %s15_s10 }
   0x4   :  { %p185_p0 = scmp.ne.s32.totalorder %s15_s10, %s184_s11  ;;  %p190_p2 = scmp.lt.s32.totalorder %s184_s11, %s184_s11 }
   0x6   :  { %p191_p3 = por %p190_p2, %p189_p1 }
   0x8   :  { %p192_p4 = pnand %p191_p3, %p185_p0 }
   0xa   :  { %195 = shalt.err (!%p192_p4)
}
   0xb   :  { %s209_s12 = smov 128   ;;  %s210_s13 = smov 8  }
   0xc   :  { %20 = dma.hbm_to_vmem [thread:$0]  %s246_s0, 256, %s15_s10, [#allocation3], %s209_s12, %s209_s12, %s210_s13  }
   0xd   :  { %204 = dma.done.wait [#allocation3], 256  }
   0xe   :  { %205 = vsyncadd [#allocation3], 4294967040  ;;  %v26_v0 = vld [vmem:[#allocation2] sm:$0xff]  ;;  %v27_v1 = vld [vmem:[#allocation2 + $0x8] sm:$0xff]  ;;  %v61_v2 = vlaneseq  ;;  %vm78_vm3 = vcmask 130048   ;;  %vm129_vm6 = vcmask 122880  }
   0xf   :  { %28 = vxpose.xlu0.b32.start [1/2] (short) (narrow) %v26_v0, 32  ;;  %v156_v6 = vld [vmem:[%s247_s1] ss:$0 sm:$0xff]  ;;  %s211_s1 = smov [#allocation5]  }
  0x10   :  { %v62_v3 = vshrl.u32 %v61_v2, 7  ;;  %v124_v58 = vand.u32 127, %v61_v2 }
  0x12   :  { %v63_v4 = vadd.s32 8, %v62_v3  ;;  %v64_v7 = vadd.s32 16, %v62_v3  ;;  %vm70_vm1 = vcmp.eq.s32.totalorder %v62_v3, %v156_v6  ;;  %v65_v10 = vadd.s32 24, %v62_v3 }
  0x13   :  { %29 = vxpose.xlu0.b32.end [2/2] (short) (narrow) %v27_v1, 32  ;;  %vm127_vm5 = vcmp.lt.s32.totalorder %v124_v58, 16 }
  0x14   :  { %vm71_vm0 = vcmp.eq.s32.totalorder %v63_v4, %v156_v6  ;;  %vm72_vm2 = vcmp.eq.s32.totalorder %v64_v7, %v156_v6  ;;  %vm73_vm4 = vcmp.eq.s32.totalorder %v65_v10, %v156_v6 }
  0x8b   :  { %v44_v5 = vpop.trf.xlu0 }
  0x8c   :  { %v74_v11 = vsel %vm70_vm1, %v44_v5, 0.0 }
  0x8d   :  { %v79_v15 = vsel %vm78_vm3, %v74_v11, 0.0 }
  0x8f   :  { %v45_v8 = vpop.trf.xlu0 }
  0x90   :  { %v75_v9 = vsel %vm71_vm0, %v45_v8, 0.0 }
  0x91   :  { %v80_v12 = vsel %vm78_vm3, %v75_v9, 0.0 }
  0x92   :  { %v81_v17 = vadd.f32 %v80_v12, %v79_v15 }
  0x93   :  { %v46_v13 = vpop.trf.xlu0 }
  0x94   :  { %v76_v14 = vsel %vm72_vm2, %v46_v13, 0.0 }
  0x95   :  { %v82_v16 = vsel %vm78_vm3, %v76_v14, 0.0 }
  0x96   :  { %v83_v19 = vadd.f32 %v82_v16, %v81_v17 }
  0x97   :  { %v47_v18 = vpop.trf.xlu0 }
  0x98   :  { %v77_v20 = vsel %vm73_vm4, %v47_v18, 0.0 }
  0x99   :  { %v84_v21 = vsel %vm78_vm3, %v77_v20, 0.0 }
  0x9a   :  { %v85_v22 = vadd.f32 %v84_v21, %v83_v19 }
  0x9c   :  { %v86_v23 = vrot.slane %v85_v22, 4 }
  0x9e   :  { %v87_v24 = vadd.f32 %v86_v23, %v85_v22 }
  0xa0   :  { %v88_v25 = vrot.slane %v87_v24, 2 }
  0xa2   :  { %v89_v26 = vadd.f32 %v88_v25, %v87_v24 }
  0xa4   :  { %v90_v27 = vrot.slane %v89_v26, 1 }
  0xa6   :  { %v91_v28 = vadd.f32 %v90_v27, %v89_v26 }
  0xa8   :  { %v92_v29 = vsub.f32 %v44_v5, %v91_v28  ;;  %v93_v30 = vsub.f32 %v45_v8, %v91_v28  ;;  %v94_v31 = vsub.f32 %v46_v13, %v91_v28  ;;  %v95_v32 = vsub.f32 %v47_v18, %v91_v28 }
  0xaa   :  { %v96_v33 = vmul.f32 1.442695, %v92_v29  ;;  %v98_v34 = vmul.f32 1.442695, %v93_v30  ;;  %v100_v35 = vmul.f32 1.442695, %v94_v31 }
  0xab   :  { %v102_v36 = vmul.f32 1.442695, %v95_v32 }
  0xac   :  { %164 = vpow2.f32 %v96_v33 }
  0xad   :  { %166 = vpow2.f32 %v98_v34 }
  0xae   :  { %168 = vpow2.f32 %v100_v35 }
  0xaf   :  { %170 = vpow2.f32 %v102_v36 }
  0xb9   :  { %v165_v37 = vpop.eup %164 }
  0xba   :  { %v167_v38 = vpop.eup %166  ;;  %v104_v39 = vsel %vm78_vm3, %v165_v37, 0.0 }
  0xbb   :  { %v169_v40 = vpop.eup %168  ;;  %v105_v41 = vsel %vm78_vm3, %v167_v38, 0.0 }
  0xbc   :  { %v171_v42 = vpop.eup %170  ;;  %v106_v43 = vadd.f32 %v105_v41, %v104_v39  ;;  %v107_v44 = vsel %vm78_vm3, %v169_v40, 0.0 }
  0xbd   :  { %v109_v46 = vsel %vm78_vm3, %v171_v42, 0.0 }
  0xbe   :  { %v108_v45 = vadd.f32 %v107_v44, %v106_v43 }
  0xc0   :  { %v110_v47 = vadd.f32 %v109_v46, %v108_v45 }
  0xc2   :  { %v111_v48 = vrot.slane %v110_v47, 4 }
  0xc4   :  { %v112_v49 = vadd.f32 %v111_v48, %v110_v47 }
  0xc6   :  { %v113_v50 = vrot.slane %v112_v49, 2 }
  0xc8   :  { %v114_v51 = vadd.f32 %v113_v50, %v112_v49 }
  0xca   :  { %v115_v52 = vrot.slane %v114_v51, 1 }
  0xcc   :  { %v116_v53 = vadd.f32 %v115_v52, %v114_v51 }
  0xce   :  { %172 = vrcp.f32 %v116_v53 }
  0xdb   :  { %v173_v54 = vpop.eup %172 }
  0xdc   :  { %v118_v55 = vsub.f32 1.0, %v173_v54 }
  0xde   :  { %v119_v56 = vmul.f32 %v173_v54, %v118_v55 }
  0xe0   :  { %v120_v57 = vadd.f32 1.0, %v119_v56 }
  0xe2   :  { %174 = vrcp.f32 %v120_v57 }
  0xef   :  { %v175_v59 = vpop.eup %174 }
  0xf0   :  { %v128_v60 = vsel %vm127_vm5, %v175_v59, 0.0 }
  0xf1   :  { %v130_v61 = vsel %vm129_vm6, %v128_v60, 0.0 }
  0xf2   :  { %131 = vadd.xlane.f32.xlu1 %v130_v61 }
 0x17b   :  { %v132_v62 = vpop.xlane.xlu1 %131 }
 0x17c   :  { %v133_v63 = vrot.slane %v132_v62, 4 }
 0x17e   :  { %v134_v0 = vadd.f32 %v133_v63, %v132_v62 }
 0x180   :  { %v135_v1 = vrot.slane %v134_v0, 2 }
 0x182   :  { %v136_v3 = vadd.f32 %v135_v1, %v134_v0 }
 0x184   :  { %v137_v4 = vrot.slane %v136_v3, 1 }
 0x186   :  { %v138_v5 = vadd.f32 %v137_v4, %v136_v3 }
 0x188   :  { %157 = vpush %v138_v5 }
 0x1b9   :  { %s158_s0 = spop %157 }
 0x1ba   :  { %141 = sst [smem:[#allocation5]] %s158_s0 }
 0x1bb   :  { %149 = dma.smem_to_hbm %s211_s1, 16, %s248_s2, [#allocation4]  }
 0x1bc   :  { %206 = dma.done.wait [#allocation4], 16  }
 0x1bd   :  { %207 = vsyncadd [#allocation4], 4294967280 }
 0x1be   :  { %153 = sfence }
 0x1bf   :  { %154 = vsyncpa [#allocation3], 1 }
 0x1c0   :  { %155 = vsyncpa [#allocation4], 1 }

</bundles_post_ra>
